<compile_context>
chip_gen: v5e
topology: v5e:2x2
jax: 0.10.0
libtpu: 0.0.40
codegen_flags: <defaults>
</compile_context>

<pallas_src>
import functools

import jax
import jax.numpy as jnp
from jax.experimental import pallas as pl
from jax.experimental.pallas import tpu as pltpu

_EPS = 1e-5
_LANE = 128
_VMEM_BUDGET = 20 * 1024 * 1024   # target working set for tile sizing
_VMEM_LIMIT = 48 * 1024 * 1024    # scoped VMEM cap (leaves headroom on v7x's 64 MiB)


def _round_up(x: int, m: int) -> int:
    return (x + m - 1) // m * m


# --------------- single-pass kernel: full node axis resident per stripe ---------------
def _bn_fused_kernel(x_ref, g_ref, b_ref, o_ref):
    """x_ref: (N, TC); g_ref/b_ref: (1, TC) f32; o_ref: (N, TC)."""
    xf = x_ref[...].astype(jnp.float32)
    inv_n = jnp.float32(1.0 / xf.shape[0])
    mean = jnp.sum(xf, axis=0, keepdims=True) * inv_n
    var = jnp.sum(jnp.square(xf - mean), axis=0, keepdims=True) * inv_n
    # Fold affine into per-channel scale/shift: y = x*scale + shift (2 ops/elem).
    scale = jax.lax.rsqrt(var + _EPS) * g_ref[...]
    shift = b_ref[...] - mean * scale
    o_ref[...] = (xf * scale + shift).astype(o_ref.dtype)


# --------------- two-pass kernels for very large N ---------------
def _bn_stats_kernel(x_ref, sum_ref, sq_ref, *, n_total):
    """Accumulate per-channel sum / sum-of-squares over node tiles (f32)."""
    n_idx = pl.program_id(1)

    @pl.when(n_idx == 0)
    def _():
        sum_ref[...] = jnp.zeros_like(sum_ref)
        sq_ref[...] = jnp.zeros_like(sq_ref)

    xf = x_ref[...].astype(jnp.float32)
    tn = xf.shape[0]
    # Mask rows past the true N (last node-tile may be partial -> undefined reads).
    row = jax.lax.broadcasted_iota(jnp.int32, xf.shape, 0) + n_idx * tn
    xf = jnp.where(row < n_total, xf, 0.0)
    sum_ref[...] += jnp.sum(xf, axis=0, keepdims=True)
    sq_ref[...] += jnp.sum(xf * xf, axis=0, keepdims=True)


def _bn_apply_kernel(x_ref, scale_ref, shift_ref, o_ref):
    y = x_ref[...].astype(jnp.float32) * scale_ref[...] + shift_ref[...]
    o_ref[...] = y.astype(o_ref.dtype)


def normalization_forward(x, gamma, beta, norm_type: str = "Batch"):
    """Forward pass of `Normalization` (default 'Batch'; 'None' is identity)."""
    if norm_type == "None":
        return x
    if norm_type != "Batch":
        # TODO(synk): 'Layer'/'Instance'/'GraphSize'/'Pair' need a per-graph `batch`
        # index vector (segment reductions) not present in this forward signature.
        raise NotImplementedError(f"norm_type={norm_type!r} not implemented")

    N, C = x.shape
    out_dtype = x.dtype
    itemsize = jnp.dtype(x.dtype).itemsize

    # Lane-dense channel axis: pad C up to a multiple of 128 so stores are unmasked.
    C_pad = _round_up(C, _LANE)
    if C_pad != C:
        x_p = jnp.pad(x, ((0, 0), (0, C_pad - C)))
        gamma_p = jnp.pad(gamma.astype(jnp.float32), (0, C_pad - C), constant_values=1.0)
        beta_p = jnp.pad(beta.astype(jnp.float32), (0, C_pad - C))
    else:
        x_p = x
        gamma_p = gamma.astype(jnp.float32)
        beta_p = beta.astype(jnp.float32)
    gamma_p = gamma_p.reshape(1, C_pad)
    beta_p = beta_p.reshape(1, C_pad)

    # Per-element VMEM footprint estimate: double-buffered in + out (native dtype)
    # plus ~2 f32 intermediates inside the kernel.
    per_elem = 4 * itemsize + 8

    tc_fused = min((_VMEM_BUDGET // (per_elem * N)) // _LANE * _LANE, C_pad)

    if tc_fused >= _LANE:
        # -------- single pass: each channel stripe holds all N rows --------
        out_p = pl.pallas_call(
            _bn_fused_kernel,
            out_shape=jax.ShapeDtypeStruct((N, C_pad), out_dtype),
            grid=(pl.cdiv(C_pad, tc_fused),),
            in_specs=[
                pl.BlockSpec((N, tc_fused), lambda j: (0, j)),
                pl.BlockSpec((1, tc_fused), lambda j: (0, j)),
                pl.BlockSpec((1, tc_fused), lambda j: (0, j)),
            ],
            out_specs=pl.BlockSpec((N, tc_fused), lambda j: (0, j)),
            compiler_params=pltpu.CompilerParams(
                dimension_semantics=("parallel",),
                vmem_limit_bytes=_VMEM_LIMIT,
            ),
        )(x_p, gamma_p, beta_p)
    else:
        # -------- two passes: stats (reduce over node tiles) + apply --------
        TN = 512
        tc = min((_VMEM_BUDGET // (per_elem * TN)) // _LANE * _LANE, C_pad)
        tc = max(tc, _LANE)
        n_c = pl.cdiv(C_pad, tc)
        n_n = pl.cdiv(N, TN)

        sums, sqs = pl.pallas_call(
            functools.partial(_bn_stats_kernel, n_total=N),
            out_shape=(
                jax.ShapeDtypeStruct((1, C_pad), jnp.float32),
                jax.ShapeDtypeStruct((1, C_pad), jnp.float32),
            ),
            grid=(n_c, n_n),  # reduction (node) axis last
            in_specs=[pl.BlockSpec((TN, tc), lambda j, n: (n, j))],
            out_specs=(
                pl.BlockSpec((1, tc), lambda j, n: (0, j)),
                pl.BlockSpec((1, tc), lambda j, n: (0, j)),
            ),
            compiler_params=pltpu.CompilerParams(
                dimension_semantics=("parallel", "arbitrary"),
                vmem_limit_bytes=_VMEM_LIMIT,
            ),
        )(x_p)

        inv_n = jnp.float32(1.0 / N)
        mean = sums * inv_n
        var = jnp.maximum(sqs * inv_n - mean * mean, 0.0)  # f32 accumulation
        scale = gamma_p * jax.lax.rsqrt(var + _EPS)
        shift = beta_p - mean * scale

        out_p = pl.pallas_call(
            _bn_apply_kernel,
            out_shape=jax.ShapeDtypeStruct((N, C_pad), out_dtype),
            grid=(n_n, n_c),
            in_specs=[
                pl.BlockSpec((TN, tc), lambda i, j: (i, j)),
                pl.BlockSpec((1, tc), lambda i, j: (0, j)),
                pl.BlockSpec((1, tc), lambda i, j: (0, j)),
            ],
            out_specs=pl.BlockSpec((TN, tc), lambda i, j: (i, j)),
            compiler_params=pltpu.CompilerParams(
                dimension_semantics=("parallel", "parallel"),
                vmem_limit_bytes=_VMEM_LIMIT,
            ),
        )(x_p, scale, shift)

    if C_pad != C:
        out_p = out_p[:, :C]
    return out_p


if __name__ == "__main__":
    key = jax.random.PRNGKey(0)
    num_nodes = 64
    hidden_channels = 32

    x = jax.random.normal(key, (num_nodes, hidden_channels), dtype=jnp.float32)

    # BatchNorm.reset_parameters(): weight = ones, bias = zeros.
    gamma = jnp.ones((hidden_channels,), dtype=jnp.float32)
    beta = jnp.zeros((hidden_channels,), dtype=jnp.float32)

    out = normalization_forward(x, gamma, beta, norm_type="Batch")
    out = jax.block_until_ready(out)

    # sanity check against pure-JAX reference
    mean = jnp.mean(x, axis=0, keepdims=True)
    var = jnp.mean((x - mean) ** 2, axis=0, keepdims=True)
    ref = (x - mean) / jnp.sqrt(var + _EPS) * gamma + beta
    assert out.shape == ref.shape
    assert jnp.allclose(out, ref, atol=1e-5, rtol=1e-5), "mismatch vs reference"

    print("KERNEL_OK")
</pallas_src>

<mosaic_0001>
module attributes {stable_mosaic.version = 11 : i64} {
  func.func @_bn_fused_kernel(%arg0: i32, %arg1: memref<64x128xf32, #tpu.memory_space<vmem>>, %arg2: memref<1x128xf32, #tpu.memory_space<vmem>>, %arg3: memref<1x128xf32, #tpu.memory_space<vmem>>, %arg4: memref<64x128xf32, #tpu.memory_space<vmem>>) attributes {dimension_semantics = [#tpu.dimension_semantics<parallel>], iteration_bounds = array<i64: 1>, scalar_prefetch = 0 : i64, scratch_operands = 0 : i64, tpu.core_type = #tpu.core_type<tc>, window_params = [{transform_indices = @transform_0, window_bounds = array<i64: 64, 128>}, {transform_indices = @transform_1, window_bounds = array<i64: 1, 128>}, {transform_indices = @transform_2, window_bounds = array<i64: 1, 128>}, {transform_indices = @transform_3, window_bounds = array<i64: 64, 128>}]} {
    %c0 = arith.constant 0 : index
    %c0_0 = arith.constant 0 : index
    %0 = vector.load %arg1[%c0, %c0_0] : memref<64x128xf32, #tpu.memory_space<vmem>>, vector<64x128xf32>
    %cst = arith.constant dense<0.000000e+00> : vector<128xf32>
    %1 = vector.multi_reduction <add>, %0, %cst [0] : vector<64x128xf32> to vector<128xf32>
    %2 = vector.shape_cast %1 : vector<128xf32> to vector<1x128xf32>
    %cst_1 = arith.constant 1.562500e-02 : f32
    %3 = vector.broadcast %cst_1 : f32 to vector<1x128xf32>
    %4 = arith.mulf %2, %3 : vector<1x128xf32>
    %5 = vector.broadcast %4 : vector<1x128xf32> to vector<64x128xf32>
    %6 = arith.subf %0, %5 : vector<64x128xf32>
    %7 = arith.mulf %6, %6 : vector<64x128xf32>
    %cst_2 = arith.constant dense<0.000000e+00> : vector<128xf32>
    %8 = vector.multi_reduction <add>, %7, %cst_2 [0] : vector<64x128xf32> to vector<128xf32>
    %9 = vector.shape_cast %8 : vector<128xf32> to vector<1x128xf32>
    %cst_3 = arith.constant 1.562500e-02 : f32
    %10 = vector.broadcast %cst_3 : f32 to vector<1x128xf32>
    %11 = arith.mulf %9, %10 : vector<1x128xf32>
    %cst_4 = arith.constant 9.99999974E-6 : f32
    %12 = vector.broadcast %cst_4 : f32 to vector<1x128xf32>
    %13 = arith.addf %11, %12 : vector<1x128xf32>
    %14 = math.rsqrt %13 : vector<1x128xf32>
    %c0_5 = arith.constant 0 : index
    %c0_6 = arith.constant 0 : index
    %15 = vector.load %arg2[%c0_5, %c0_6] : memref<1x128xf32, #tpu.memory_space<vmem>>, vector<1x128xf32>
    %16 = arith.mulf %14, %15 : vector<1x128xf32>
    %c0_7 = arith.constant 0 : index
    %c0_8 = arith.constant 0 : index
    %17 = vector.load %arg3[%c0_7, %c0_8] : memref<1x128xf32, #tpu.memory_space<vmem>>, vector<1x128xf32>
    %18 = arith.mulf %4, %16 : vector<1x128xf32>
    %19 = arith.subf %17, %18 : vector<1x128xf32>
    %20 = vector.broadcast %16 : vector<1x128xf32> to vector<64x128xf32>
    %21 = arith.mulf %0, %20 : vector<64x128xf32>
    %22 = vector.broadcast %19 : vector<1x128xf32> to vector<64x128xf32>
    %23 = arith.addf %21, %22 : vector<64x128xf32>
    %c0_9 = arith.constant 0 : index
    %c0_10 = arith.constant 0 : index
    %24 = vector.load %arg4[%c0_9, %c0_10] : memref<64x128xf32, #tpu.memory_space<vmem>>, vector<64x128xf32>
    tpu.vector_store %arg4[%c0_9, %c0_10], %23 {strides = array<i32>} : memref<64x128xf32, #tpu.memory_space<vmem>>, vector<64x128xf32>,
    return
  }
  func.func @transform_0(%arg0: i32) -> (i32, i32) {
    %c0_i32 = arith.constant 0 : i32
    %c0_i32_0 = arith.constant 0 : i32
    return %c0_i32, %arg0 : i32, i32
  }
  func.func @transform_1(%arg0: i32) -> (i32, i32) {
    %c0_i32 = arith.constant 0 : i32
    %c0_i32_0 = arith.constant 0 : i32
    return %c0_i32, %arg0 : i32, i32
  }
  func.func @transform_2(%arg0: i32) -> (i32, i32) {
    %c0_i32 = arith.constant 0 : i32
    %c0_i32_0 = arith.constant 0 : i32
    return %c0_i32, %arg0 : i32, i32
  }
  func.func @transform_3(%arg0: i32) -> (i32, i32) {
    %c0_i32 = arith.constant 0 : i32
    %c0_i32_0 = arith.constant 0 : i32
    return %c0_i32, %arg0 : i32, i32
  }
}

</mosaic_0001>

<bundles_post_ra>
// kernel: tpu_custom_call.1
= control target key start
LH: loop header
LB: loop body
LE: loop exit
PB: predicated region body
PF: predicated region fallthrough
CT: control target
= control target key end

     0   :  { %8 = vsyncpa [#allocation3], 0  ;;  %s329_s0 = inlined_call_operand.hbm [shape: f32[64,128], index: 0, kind: input, shape index: {}]   ;;  %s330_s1 = inlined_call_operand.hbm [shape: f32[1,128], index: 1, kind: input, shape index: {}]   ;;  %s331_s2 = inlined_call_operand.vmem [shape: f32[1,128], index: 2, kind: input, shape index: {}]   ;;  %s332_s3 = inlined_call_operand.hbm [shape: f32[64,128], index: 3, kind: output, shape index: {}]  }
   0x1   :  { %9 = vsyncpa [#allocation6], 0 }
   0x2   :  { %10 = vsyncpa [#allocation4], 0  ;;  %s15_s14 = sshll.u32 %s329_s0, 4  ;;  %s246_s15 = smov [#allocation2]   ;;  %s16_s14 = int_to_ptr.hbm [resolvable:$true] %s15_s14 }
   0x3   :  { %s17_s16 = sshll.u32 %s246_s15, 4  ;;  %s29_s19 = sshll.u32 %s330_s1, 4  ;;  %s18_s16 = int_to_ptr.vmem [resolvable:$true] %s17_s16  ;;  %s30_s19 = int_to_ptr.hbm [resolvable:$true] %s29_s19 }
   0x4   :  { %s247_s20 = smov 128   ;;  %s248_s21 = smov 8  }
   0x5   :  { %23 = dma.hbm_to_vmem [thread:$0]  %s16_s14, 1024, %s18_s16, [#allocation3], %s247_s20, %s247_s20, %s248_s21  }
   0x6   :  { %s249_s22 = smov [#allocation5]  }
   0x7   :  { %s31_s23 = sshll.u32 %s249_s22, 4  ;;  %s32_s23 = int_to_ptr.vmem [resolvable:$true] %s31_s23 }
   0x8   :  { %34 = dma.hbm_to_vmem [thread:$0]  %s30_s19, 16, %s32_s23, [#allocation6]  }
   0x9   :  { %240 = dma.done.wait [#allocation3], 1024  }
   0xa   :  { %241 = vsyncadd [#allocation3], 4294966272 }
   0xb   :  { %242 = dma.done.wait [#allocation6], 16  }
   0xc   :  { %243 = vsyncadd [#allocation6], 4294967280  ;;  %v280_v0 = vld [vmem:[#allocation2] sm:$0xff]  ;;  %v282_v1 = vld [vmem:[#allocation2 + $0x8] sm:$0xff]  ;;  %s147_s27 = sshll.u32 %s332_s3, 4  ;;  %s148_s27 = int_to_ptr.hbm [resolvable:$true] %s147_s27 }
   0xd   :  { %v284_v2 = vld [vmem:[#allocation2 + $0x10] sm:$0xff]  ;;  %v53_v3 = vadd.f32 %v282_v1, %v280_v0  ;;  %v288_v4 = vld [vmem:[#allocation2 + $0x18] sm:$0xff]  ;;  %v291_v6 = vld [vmem:[#allocation2 + $0x20] sm:$0xff] }
   0xe   :  { %v294_v8 = vld [vmem:[#allocation2 + $0x28] sm:$0xff]  ;;  %v297_v10 = vld [vmem:[#allocation2 + $0x30] sm:$0xff]  ;;  %v300_v12 = vld [vmem:[#allocation2 + $0x38] sm:$0xff] }
   0xf   :  { %v54_v5 = vadd.f32 %v53_v3, %v284_v2  ;;  %v108_v59 = vld [vmem:[#allocation5] sm:$0x1] }
  0x10   :  { %v110_v62 = vld [vmem:[%s331_s2] sm:$0x1]  ;;  %s250_s2 = smov [#allocation7]  }
  0x11   :  { %v55_v7 = vadd.f32 %v54_v5, %v288_v4  ;;  %s145_s24 = sshll.u32 %s250_s2, 4  ;;  %s146_s24 = int_to_ptr.vmem [resolvable:$true] %s145_s24 }
  0x13   :  { %v56_v9 = vadd.f32 %v55_v7, %v291_v6 }
  0x15   :  { %v57_v11 = vadd.f32 %v56_v9, %v294_v8 }
  0x17   :  { %v58_v13 = vadd.f32 %v57_v11, %v297_v10 }
  0x19   :  { %v59_v14 = vadd.f32 %v58_v13, %v300_v12 }
  0x1b   :  { %v60_v15 = vrot.slane %v59_v14, 4 }
  0x1d   :  { %v61_v16 = vadd.f32 %v60_v15, %v59_v14 }
  0x1f   :  { %v62_v17 = vrot.slane %v61_v16, 2 }
  0x21   :  { %v63_v18 = vadd.f32 %v62_v17, %v61_v16 }
  0x23   :  { %v64_v19 = vrot.slane %v63_v18, 1 }
  0x25   :  { %v65_v20 = vadd.f32 %v64_v19, %v63_v18 }
  0x27   :  { %v66_v21 = vmul.f32 0.015625, %v65_v20 }
  0x29   :  { %v67_v22 = vsub.f32 %v280_v0, %v66_v21  ;;  %v68_v23 = vsub.f32 %v282_v1, %v66_v21  ;;  %v69_v24 = vsub.f32 %v284_v2, %v66_v21  ;;  %v70_v25 = vsub.f32 %v288_v4, %v66_v21 }
  0x2a   :  { %v71_v26 = vsub.f32 %v291_v6, %v66_v21  ;;  %v72_v30 = vsub.f32 %v294_v8, %v66_v21  ;;  %v73_v33 = vsub.f32 %v297_v10, %v66_v21  ;;  %v74_v36 = vsub.f32 %v300_v12, %v66_v21 }
  0x2b   :  { %v75_v27 = vmul.f32 %v67_v22, %v67_v22  ;;  %v76_v28 = vmul.f32 %v68_v23, %v68_v23  ;;  %v77_v29 = vmul.f32 %v69_v24, %v69_v24  ;;  %v78_v31 = vmul.f32 %v70_v25, %v70_v25 }
  0x2c   :  { %v79_v34 = vmul.f32 %v71_v26, %v71_v26  ;;  %v80_v37 = vmul.f32 %v72_v30, %v72_v30  ;;  %v81_v39 = vmul.f32 %v73_v33, %v73_v33  ;;  %v82_v41 = vmul.f32 %v74_v36, %v74_v36 }
  0x2d   :  { %v83_v32 = vadd.f32 %v76_v28, %v75_v27 }
  0x2f   :  { %v84_v35 = vadd.f32 %v83_v32, %v77_v29 }
  0x31   :  { %v85_v38 = vadd.f32 %v84_v35, %v78_v31 }
  0x33   :  { %v86_v40 = vadd.f32 %v85_v38, %v79_v34 }
  0x35   :  { %v87_v42 = vadd.f32 %v86_v40, %v80_v37 }
  0x37   :  { %v88_v43 = vadd.f32 %v87_v42, %v81_v39 }
  0x39   :  { %v89_v44 = vadd.f32 %v88_v43, %v82_v41 }
  0x3b   :  { %v90_v45 = vrot.slane %v89_v44, 4 }
  0x3d   :  { %v91_v46 = vadd.f32 %v90_v45, %v89_v44 }
  0x3f   :  { %v92_v47 = vrot.slane %v91_v46, 2 }
  0x41   :  { %v93_v48 = vadd.f32 %v92_v47, %v91_v46 }
  0x43   :  { %v94_v49 = vrot.slane %v93_v48, 1 }
  0x45   :  { %v95_v50 = vadd.f32 %v94_v49, %v93_v48 }
  0x47   :  { %v96_v51 = vmul.f32 0.015625, %v95_v50 }
  0x49   :  { %v97_v52 = vadd.f32 1e-05, %v96_v51 }
  0x4b   :  { %166 = vrsqrt.f32 %v97_v52  ;;  %vm104_vm0 = vweird.f32 %v97_v52 }
  0x51   :  { %v167_v53 = vpop.eup %166 }
  0x52   :  { %v99_v54 = vmul.f32 %v167_v53, %v97_v52  ;;  %vm105_vm1 = vweird.f32 %v167_v53 }
  0x53   :  { %vm106_vm2 = vmor %vm104_vm0, %vm105_vm1 }
  0x54   :  { %v100_v55 = vmul.f32 %v167_v53, %v99_v54 }
  0x56   :  { %v101_v56 = vmul.f32 0.5, %v100_v55 }
  0x58   :  { %v102_v57 = vsub.f32 1.5, %v101_v56 }
  0x5a   :  { %v103_v58 = vmul.f32 %v167_v53, %v102_v57 }
  0x5c   :  { %v107_v60 = vsel %vm106_vm2, %v167_v53, %v103_v58 }
  0x5d   :  { %v109_v61 = vmul.f32 %v108_v59, %v107_v60 }
  0x5f   :  { %v111_v63 = vmul.f32 %v109_v61, %v66_v21  ;;  %v113_v3 = vperm.slane %v109_v61, 0 }
  0x61   :  { %v112_v5 = vsub.f32 %v110_v62, %v111_v63  ;;  %v114_v7 = vmul.f32 %v113_v3, %v280_v0  ;;  %v115_v9 = vmul.f32 %v113_v3, %v282_v1  ;;  %v116_v11 = vmul.f32 %v113_v3, %v284_v2 }
  0x62   :  { %v117_v13 = vmul.f32 %v113_v3, %v288_v4  ;;  %v118_v15 = vmul.f32 %v113_v3, %v291_v6  ;;  %v119_v16 = vmul.f32 %v113_v3, %v294_v8  ;;  %v120_v20 = vmul.f32 %v113_v3, %v297_v10 }
  0x63   :  { %v123_v14 = vperm.slane %v112_v5, 0  ;;  %v121_v22 = vmul.f32 %v113_v3, %v300_v12 }
  0x65   :  { %v125_v17 = vadd.f32 %v123_v14, %v114_v7  ;;  %v126_v18 = vadd.f32 %v123_v14, %v115_v9  ;;  %v127_v19 = vadd.f32 %v123_v14, %v116_v11  ;;  %v128_v21 = vadd.f32 %v123_v14, %v117_v13 }
  0x66   :  { %v129_v0 = vadd.f32 %v123_v14, %v118_v15  ;;  %v130_v1 = vadd.f32 %v123_v14, %v119_v16  ;;  %v131_v2 = vadd.f32 %v123_v14, %v120_v20  ;;  %v132_v4 = vadd.f32 %v123_v14, %v121_v22 }
  0x67   :  { %133 = vst [vmem:[#allocation7] sm:$0xff] %v125_v17 }
  0x68   :  { %134 = vst [vmem:[#allocation7 + $0x8] sm:$0xff] %v126_v18 }
  0x69   :  { %135 = vst [vmem:[#allocation7 + $0x10] sm:$0xff] %v127_v19 }
  0x6a   :  { %136 = vst [vmem:[#allocation7 + $0x18] sm:$0xff] %v128_v21 }
  0x6b   :  { %137 = vst [vmem:[#allocation7 + $0x20] sm:$0xff] %v129_v0 }
  0x6c   :  { %138 = vst [vmem:[#allocation7 + $0x28] sm:$0xff] %v130_v1 }
  0x6d   :  { %139 = vst [vmem:[#allocation7 + $0x30] sm:$0xff] %v131_v2 }
  0x6e   :  { %140 = vst [vmem:[#allocation7 + $0x38] sm:$0xff] %v132_v4 }
  0x6f   :  { %153 = dma.vmem_to_hbm [thread:$0]  %s146_s24, 1024, %s148_s27, [#allocation4], %s247_s20, %s247_s20, %s248_s21  }
  0x70   :  { %244 = dma.done.wait [#allocation4], 1024  }
  0x71   :  { %245 = vsyncadd [#allocation4], 4294966272 }
  0x72   :  { %158 = vsyncpa [#allocation3], 1 }
  0x73   :  { %159 = vsyncpa [#allocation6], 1 }
  0x74   :  { %160 = vsyncpa [#allocation4], 1 }

</bundles_post_ra>
